<compile_context>
chip_gen: v7x
topology: tpu7x:2x2x1
jax: 0.10.0
libtpu: 0.0.40
codegen_flags: <defaults>
</compile_context>

<pallas_src>
import functools

import jax
import jax.numpy as jnp
from jax.experimental import pallas as pl
from jax.experimental.pallas import tpu as pltpu


def _cdiv(a, b):
    return -(-a // b)


def _round_up(x, m):
    return ((x + m - 1) // m) * m


# ----------------------------------------------------------------------------- kernel
def actor_critic_fused_kernel(x_ref, w1_ref, w23_ref, w4_ref, b123_ref, b4_ref,
                              out_ref, *, action_dim):
    compute_dt = w1_ref.dtype                       # bf16 matmul operands
    x = x_ref[...].astype(compute_dt)               # cast in-kernel (no wrapper pass)

    b123 = b123_ref[...]                            # [3, Hp] f32 (VPU work stays f32)

    # layer 1 : [B, S] @ [S, Hp]
    h = jnp.dot(x, w1_ref[...], preferred_element_type=jnp.float32)
    h = jnp.maximum(h + b123[0:1, :], 0.0)

    # layer 2 : [B, Hp] @ blockdiag -> [B, Hp]
    h = jnp.dot(h.astype(compute_dt), w23_ref[0], preferred_element_type=jnp.float32)
    h = jnp.maximum(h + b123[1:2, :], 0.0)

    # layer 3
    h = jnp.dot(h.astype(compute_dt), w23_ref[1], preferred_element_type=jnp.float32)
    h = jnp.maximum(h + b123[2:3, :], 0.0)

    # layer 4 : [B, Hp] @ [Hp, OUT_PAD]  (logits in lanes 0..A-1, value in lane A)
    out = jnp.dot(h.astype(compute_dt), w4_ref[...], preferred_element_type=jnp.float32)
    out = out + b4_ref[...]                         # [B, OUT_PAD] f32

    # masked softmax over the logit lanes only (all in f32, cast only at the store)
    lane = jax.lax.broadcasted_iota(jnp.int32, out.shape, 1)
    is_logit = lane < action_dim
    masked_logits = jnp.where(is_logit, out, jnp.float32(-1e30))
    m = jnp.max(masked_logits, axis=-1, keepdims=True)
    e = jnp.exp(masked_logits - m)                  # pad/value lanes -> 0
    denom = jnp.sum(e, axis=-1, keepdims=True)
    probs = e / denom                               # exact divide: tight simplex

    # lane-dense packed output: probs | value | zeros
    packed = jnp.where(is_logit, probs,
                       jnp.where(lane == action_dim, out, 0.0))
    out_ref[...] = packed.astype(out_ref.dtype)     # bf16 store (halves write traffic)


# ----------------------------------------------------------------------------- wrapper
def _choose_bm(B, block_rows):
    """Pick block rows: ~block_rows target, minimal last-block padding, >=2 grid
    steps for larger batches so the 'parallel' axis shards across v7x's 2 TCs."""
    n = _cdiv(B, block_rows)
    if B >= 256 and n < 2:
        n = 2
    bm = _round_up(_cdiv(B, n), 16)
    if bm >= B:
        bm = B                                       # single full-batch block
    return bm


def actor_critic_forward_packed(x, packed, *, block_rows=2048):
    """x: [batch, state_dim] f32. Returns packed [batch, OUT_PAD] bf16 slab
    (probs in lanes 0..A-1, state value in lane A). Consumers (e.g. a fused
    Categorical sampling step) should index this lazily instead of re-slicing."""
    B, S = x.shape
    out_pad = packed["w4"].shape[1]
    action_dim = packed["action_dim"]

    bm = _choose_bm(B, block_rows)
    grid = (_cdiv(B, bm),)
    kernel = functools.partial(actor_critic_fused_kernel, action_dim=action_dim)

    out = pl.pallas_call(
        kernel,
        out_shape=jax.ShapeDtypeStruct((B, out_pad), jnp.bfloat16),
        grid=grid,
        in_specs=[
            pl.BlockSpec((bm, S), lambda i: (i, 0)),                      # x tile (f32)
            pl.BlockSpec(packed["w1"].shape, lambda i: (0, 0)),           # resident
            pl.BlockSpec(packed["w23"].shape, lambda i: (0, 0, 0)),       # resident
            pl.BlockSpec(packed["w4"].shape, lambda i: (0, 0)),           # resident
            pl.BlockSpec(packed["b123"].shape, lambda i: (0, 0)),         # resident
            pl.BlockSpec(packed["b4"].shape, lambda i: (0, 0)),           # resident
        ],
        out_specs=pl.BlockSpec((bm, out_pad), lambda i: (i, 0)),
        compiler_params=pltpu.CompilerParams(
            dimension_semantics=("parallel",),      # shard batch across TCs on v7x
        ),
    )(x, packed["w1"], packed["w23"], packed["w4"], packed["b123"], packed["b4"])
    return out


def unpack_outputs(packed_out, action_dim):
    """Convenience unpack (small extra XLA slices). Prefer consuming the packed
    slab directly when fusing downstream ops."""
    probs = packed_out[:, :action_dim].astype(jnp.float32)
    value = packed_out[:, action_dim:action_dim + 1].astype(jnp.float32)
    return probs, value


def actor_critic_forward(x, packed, *, block_rows=2048):
    out = actor_critic_forward_packed(x, packed, block_rows=block_rows)
    return unpack_outputs(out, packed["action_dim"])


# ----------------------------------------------------------------------------- params
def init_params(key, state_dim, action_dim, n_latent_var):
    """Synthetic per-layer params (PyTorch-equivalent layout): W [in,out], b [1,out]."""
    dims_action = [(state_dim, n_latent_var), (n_latent_var, n_latent_var),
                   (n_latent_var, n_latent_var), (n_latent_var, action_dim)]
    dims_value = [(state_dim, n_latent_var), (n_latent_var, n_latent_var),
                  (n_latent_var, n_latent_var), (n_latent_var, 1)]
    params = {}
    keys = jax.random.split(key, 16)
    ki = 0
    for prefix, dims in (("a", dims_action), ("v", dims_value)):
        for i, (din, dout) in enumerate(dims, start=1):
            bound = 1.0 / jnp.sqrt(jnp.float32(din))   # torch Linear default init range
            params[f"{prefix}w{i}"] = jax.random.uniform(
                keys[ki], (din, dout), jnp.float32, -bound, bound)
            ki += 1
            params[f"{prefix}b{i}"] = jax.random.uniform(
                keys[ki], (1, dout), jnp.float32, -bound, bound)
            ki += 1
    return params


def pack_params(p, compute_dtype=jnp.bfloat16):
    """Pack the 16 per-layer arrays into 5 lane-dense fused slabs (one-time, at init).
    Hidden width 2H is zero-padded to a multiple of 128 lanes so every intermediate
    vreg is fully dense."""
    S = p["aw1"].shape[0]
    H = p["aw2"].shape[0]
    A = p["aw4"].shape[1]
    Hp = max(128, _round_up(2 * H, 128))             # padded hidden width
    out_pad = max(128, _round_up(A + 1, 128))        # logits + value, lane-dense

    # NOTE: block-diag fusion of layers 2/3 is only efficient while 2H <= 128;
    # for n_latent_var >= 128 split layers 2/3 into two separate HxH dots instead.
    w1 = jnp.zeros((S, Hp), jnp.float32)
    w1 = w1.at[:, :H].set(p["aw1"]).at[:, H:2 * H].set(p["vw1"])

    def block_diag_padded(a, v):
        w = jnp.zeros((Hp, Hp), jnp.float32)
        return w.at[:H, :H].set(a).at[H:2 * H, H:2 * H].set(v)

    w23 = jnp.stack([block_diag_padded(p["aw2"], p["vw2"]),
                     block_diag_padded(p["aw3"], p["vw3"])])     # [2, Hp, Hp]

    w4 = jnp.zeros((Hp, out_pad), jnp.float32)
    w4 = w4.at[:H, :A].set(p["aw4"])
    w4 = w4.at[H:2 * H, A].set(p["vw4"][:, 0])                   # [Hp, OUT_PAD]

    b123 = jnp.zeros((3, Hp), jnp.float32)
    for i, (ab, vb) in enumerate((("ab1", "vb1"), ("ab2", "vb2"), ("ab3", "vb3"))):
        b123 = b123.at[i, :H].set(p[ab][0]).at[i, H:2 * H].set(p[vb][0])

    b4 = jnp.zeros((1, out_pad), jnp.float32)
    b4 = b4.at[0, :A].set(p["ab4"][0]).at[0, A].set(p["vb4"][0, 0])

    return {
        "w1": w1.astype(compute_dtype),        # bf16 matmul operands (f32 accumulate)
        "w23": w23.astype(compute_dtype),
        "w4": w4.astype(compute_dtype),
        "b123": b123,                          # biases stay f32 (VPU work)
        "b4": b4,
        "action_dim": A,
    }


# ----------------------------------------------------------------------------- reference
def reference_forward(x, p):
    """Plain-JAX f32 reference matching the PyTorch module."""
    def lin(h, w, b):
        return h @ w + b
    h = jnp.maximum(lin(x, p["aw1"], p["ab1"]), 0.0)
    h = jnp.maximum(lin(h, p["aw2"], p["ab2"]), 0.0)
    h = jnp.maximum(lin(h, p["aw3"], p["ab3"]), 0.0)
    probs = jax.nn.softmax(lin(h, p["aw4"], p["ab4"]), axis=-1)
    g = jnp.maximum(lin(x, p["vw1"], p["vb1"]), 0.0)
    g = jnp.maximum(lin(g, p["vw2"], p["vb2"]), 0.0)
    g = jnp.maximum(lin(g, p["vw3"], p["vb3"]), 0.0)
    value = lin(g, p["vw4"], p["vb4"])
    return probs, value


if __name__ == "__main__":
    state_dim, action_dim, n_latent_var = 16, 4, 32
    batch = 8

    key = jax.random.PRNGKey(0)
    k_params, k_x = jax.random.split(key)
    params = init_params(k_params, state_dim, action_dim, n_latent_var)
    packed = pack_params(params, compute_dtype=jnp.bfloat16)
    x = jax.random.normal(k_x, (batch, state_dim), jnp.float32)

    probs, value = actor_critic_forward(x, packed)
    probs = jax.block_until_ready(probs)
    value = jax.block_until_ready(value)

    ref_probs, ref_value = reference_forward(x, params)

    # bf16 matmul operands + bf16 packed output -> loosened tolerances.
    assert probs.shape == (batch, action_dim)
    assert value.shape == (batch, 1)
    assert bool(jnp.allclose(probs, ref_probs, atol=3e-2, rtol=3e-2))
    assert bool(jnp.allclose(value, ref_value, atol=5e-2, rtol=5e-2))
    assert bool(jnp.allclose(jnp.sum(probs, axis=-1), 1.0, atol=1e-2))

    # TODO(synk): Categorical sampling / log_prob / entropy from act()/evaluate()
    # are distribution ops outside the network forward; fusing them into the kernel
    # (consuming the packed probs slab before it hits HBM) is the next win.
    print("KERNEL_OK")
</pallas_src>

<mosaic_0001>
module attributes {stable_mosaic.version = 11 : i64} {
  func.func @actor_critic_fused_kernel(%arg0: i32, %arg1: memref<8x16xf32, #tpu.memory_space<vmem>>, %arg2: memref<16x128xbf16, #tpu.memory_space<vmem>>, %arg3: memref<2x128x128xbf16, #tpu.memory_space<vmem>>, %arg4: memref<128x128xbf16, #tpu.memory_space<vmem>>, %arg5: memref<3x128xf32, #tpu.memory_space<vmem>>, %arg6: memref<1x128xf32, #tpu.memory_space<vmem>>, %arg7: memref<8x128xbf16, #tpu.memory_space<vmem>>) attributes {dimension_semantics = [#tpu.dimension_semantics<parallel>], iteration_bounds = array<i64: 1>, scalar_prefetch = 0 : i64, scratch_operands = 0 : i64, tpu.core_type = #tpu.core_type<tc>, window_params = [{transform_indices = @transform_0, window_bounds = array<i64: 8, 16>}, {pipeline_mode = #tpu.pipeline_mode<synchronous>, transform_indices = @transform_1, window_bounds = array<i64: 16, 128>}, {pipeline_mode = #tpu.pipeline_mode<synchronous>, transform_indices = @transform_2, window_bounds = array<i64: 2, 128, 128>}, {pipeline_mode = #tpu.pipeline_mode<synchronous>, transform_indices = @transform_3, window_bounds = array<i64: 128, 128>}, {pipeline_mode = #tpu.pipeline_mode<synchronous>, transform_indices = @transform_4, window_bounds = array<i64: 3, 128>}, {pipeline_mode = #tpu.pipeline_mode<synchronous>, transform_indices = @transform_5, window_bounds = array<i64: 1, 128>}, {transform_indices = @transform_6, window_bounds = array<i64: 8, 128>}]} {
    %c0 = arith.constant 0 : index
    %c0_0 = arith.constant 0 : index
    %0 = vector.load %arg1[%c0, %c0_0] : memref<8x16xf32, #tpu.memory_space<vmem>>, vector<8x16xf32>
    %1 = arith.truncf %0 : vector<8x16xf32> to vector<8x16xbf16>
    %c0_1 = arith.constant 0 : index
    %c0_2 = arith.constant 0 : index
    %2 = vector.load %arg5[%c0_1, %c0_2] : memref<3x128xf32, #tpu.memory_space<vmem>>, vector<3x128xf32>
    %c0_3 = arith.constant 0 : index
    %c0_4 = arith.constant 0 : index
    %3 = vector.load %arg2[%c0_3, %c0_4] : memref<16x128xbf16, #tpu.memory_space<vmem>>, vector<16x128xbf16>
    %cst = arith.constant dense<0.000000e+00> : vector<8x128xf32>
    %4 = tpu.matmul %1, %3, %cst {dimension_numbers = #tpu.dot_dimension_numbers<[1], [0], [0], [1], [0, 0, 1, 1], [], []>} : vector<8x16xbf16>, vector<16x128xbf16>, vector<8x128xf32> -> vector<8x128xf32>
    %5 = vector.extract_strided_slice %2 {offsets = [0, 0], sizes = [1, 128], strides = [1, 1]} : vector<3x128xf32> to vector<1x128xf32>
    %6 = vector.broadcast %5 : vector<1x128xf32> to vector<8x128xf32>
    %7 = arith.addf %4, %6 : vector<8x128xf32>
    %cst_5 = arith.constant 0.000000e+00 : f32
    %8 = vector.broadcast %cst_5 : f32 to vector<8x128xf32>
    %9 = arith.maximumf %7, %8 : vector<8x128xf32>
    %10 = arith.truncf %9 : vector<8x128xf32> to vector<8x128xbf16>
    %c0_6 = arith.constant 0 : index
    %c0_7 = arith.constant 0 : index
    %c0_8 = arith.constant 0 : index
    %11 = vector.load %arg3[%c0_6, %c0_7, %c0_8] : memref<2x128x128xbf16, #tpu.memory_space<vmem>>, vector<1x128x128xbf16>
    %12 = vector.shape_cast %11 : vector<1x128x128xbf16> to vector<128x128xbf16>
    %cst_9 = arith.constant dense<0.000000e+00> : vector<8x128xf32>
    %13 = tpu.matmul %10, %12, %cst_9 {dimension_numbers = #tpu.dot_dimension_numbers<[1], [0], [0], [1], [0, 0, 1, 1], [], []>} : vector<8x128xbf16>, vector<128x128xbf16>, vector<8x128xf32> -> vector<8x128xf32>
    %14 = vector.extract_strided_slice %2 {offsets = [1, 0], sizes = [1, 128], strides = [1, 1]} : vector<3x128xf32> to vector<1x128xf32>
    %15 = vector.broadcast %14 : vector<1x128xf32> to vector<8x128xf32>
    %16 = arith.addf %13, %15 : vector<8x128xf32>
    %cst_10 = arith.constant 0.000000e+00 : f32
    %17 = vector.broadcast %cst_10 : f32 to vector<8x128xf32>
    %18 = arith.maximumf %16, %17 : vector<8x128xf32>
    %19 = arith.truncf %18 : vector<8x128xf32> to vector<8x128xbf16>
    %c1 = arith.constant 1 : index
    %c0_11 = arith.constant 0 : index
    %c0_12 = arith.constant 0 : index
    %20 = vector.load %arg3[%c1, %c0_11, %c0_12] : memref<2x128x128xbf16, #tpu.memory_space<vmem>>, vector<1x128x128xbf16>
    %21 = vector.shape_cast %20 : vector<1x128x128xbf16> to vector<128x128xbf16>
    %cst_13 = arith.constant dense<0.000000e+00> : vector<8x128xf32>
    %22 = tpu.matmul %19, %21, %cst_13 {dimension_numbers = #tpu.dot_dimension_numbers<[1], [0], [0], [1], [0, 0, 1, 1], [], []>} : vector<8x128xbf16>, vector<128x128xbf16>, vector<8x128xf32> -> vector<8x128xf32>
    %23 = vector.extract_strided_slice %2 {offsets = [2, 0], sizes = [1, 128], strides = [1, 1]} : vector<3x128xf32> to vector<1x128xf32>
    %24 = vector.broadcast %23 : vector<1x128xf32> to vector<8x128xf32>
    %25 = arith.addf %22, %24 : vector<8x128xf32>
    %cst_14 = arith.constant 0.000000e+00 : f32
    %26 = vector.broadcast %cst_14 : f32 to vector<8x128xf32>
    %27 = arith.maximumf %25, %26 : vector<8x128xf32>
    %28 = arith.truncf %27 : vector<8x128xf32> to vector<8x128xbf16>
    %c0_15 = arith.constant 0 : index
    %c0_16 = arith.constant 0 : index
    %29 = vector.load %arg4[%c0_15, %c0_16] : memref<128x128xbf16, #tpu.memory_space<vmem>>, vector<128x128xbf16>
    %cst_17 = arith.constant dense<0.000000e+00> : vector<8x128xf32>
    %30 = tpu.matmul %28, %29, %cst_17 {dimension_numbers = #tpu.dot_dimension_numbers<[1], [0], [0], [1], [0, 0, 1, 1], [], []>} : vector<8x128xbf16>, vector<128x128xbf16>, vector<8x128xf32> -> vector<8x128xf32>
    %c0_18 = arith.constant 0 : index
    %c0_19 = arith.constant 0 : index
    %31 = vector.load %arg6[%c0_18, %c0_19] : memref<1x128xf32, #tpu.memory_space<vmem>>, vector<1x128xf32>
    %32 = vector.broadcast %31 : vector<1x128xf32> to vector<8x128xf32>
    %33 = arith.addf %30, %32 : vector<8x128xf32>
    %34 = tpu.iota {dimensions = array<i32: 1>} : vector<8x128xi32>
    %c4_i32 = arith.constant 4 : i32
    %35 = vector.broadcast %c4_i32 : i32 to vector<8x128xi32>
    %36 = arith.cmpi slt, %34, %35 : vector<8x128xi32>
    %cst_20 = arith.constant -1.000000e+30 : f32
    %37 = vector.broadcast %cst_20 : f32 to vector<8x128xf32>
    %38 = arith.select %36, %33, %37 : vector<8x128xi1>, vector<8x128xf32>
    %cst_21 = arith.constant dense<0xFF800000> : vector<8xf32>
    %39 = vector.multi_reduction <maximumf>, %38, %cst_21 [1] : vector<8x128xf32> to vector<8xf32>
    %40 = vector.shape_cast %39 : vector<8xf32> to vector<8x1xf32>
    %41 = vector.broadcast %40 : vector<8x1xf32> to vector<8x128xf32>
    %42 = arith.subf %38, %41 : vector<8x128xf32>
    %43 = math.exp %42 : vector<8x128xf32>
    %cst_22 = arith.constant dense<0.000000e+00> : vector<8xf32>
    %44 = vector.multi_reduction <add>, %43, %cst_22 [1] : vector<8x128xf32> to vector<8xf32>
    %45 = vector.shape_cast %44 : vector<8xf32> to vector<8x1xf32>
    %46 = vector.broadcast %45 : vector<8x1xf32> to vector<8x128xf32>
    %47 = arith.divf %43, %46 : vector<8x128xf32>
    %c4_i32_23 = arith.constant 4 : i32
    %48 = vector.broadcast %c4_i32_23 : i32 to vector<8x128xi32>
    %49 = arith.cmpi eq, %34, %48 : vector<8x128xi32>
    %cst_24 = arith.constant 0.000000e+00 : f32
    %50 = vector.broadcast %cst_24 : f32 to vector<8x128xf32>
    %51 = arith.select %49, %33, %50 : vector<8x128xi1>, vector<8x128xf32>
    %52 = arith.select %36, %47, %51 : vector<8x128xi1>, vector<8x128xf32>
    %53 = arith.truncf %52 : vector<8x128xf32> to vector<8x128xbf16>
    %c0_25 = arith.constant 0 : index
    %c0_26 = arith.constant 0 : index
    %54 = vector.load %arg7[%c0_25, %c0_26] : memref<8x128xbf16, #tpu.memory_space<vmem>>, vector<8x128xbf16>
    tpu.vector_store %arg7[%c0_25, %c0_26], %53 {strides = array<i32>} : memref<8x128xbf16, #tpu.memory_space<vmem>>, vector<8x128xbf16>,
    return
  }
  func.func @transform_0(%arg0: i32) -> (i32, i32) {
    %c0_i32 = arith.constant 0 : i32
    %c0_i32_0 = arith.constant 0 : i32
    return %arg0, %c0_i32 : i32, i32
  }
  func.func @transform_1(%arg0: i32) -> (i32, i32) {
    %c0_i32 = arith.constant 0 : i32
    %c0_i32_0 = arith.constant 0 : i32
    %c0_i32_1 = arith.constant 0 : i32
    return %c0_i32, %c0_i32_0 : i32, i32
  }
  func.func @transform_2(%arg0: i32) -> (i32, i32, i32) {
    %c0_i32 = arith.constant 0 : i32
    %c0_i32_0 = arith.constant 0 : i32
    %c0_i32_1 = arith.constant 0 : i32
    %c0_i32_2 = arith.constant 0 : i32
    return %c0_i32, %c0_i32_0, %c0_i32_1 : i32, i32, i32
  }
  func.func @transform_3(%arg0: i32) -> (i32, i32) {
    %c0_i32 = arith.constant 0 : i32
    %c0_i32_0 = arith.constant 0 : i32
    %c0_i32_1 = arith.constant 0 : i32
    return %c0_i32, %c0_i32_0 : i32, i32
  }
  func.func @transform_4(%arg0: i32) -> (i32, i32) {
    %c0_i32 = arith.constant 0 : i32
    %c0_i32_0 = arith.constant 0 : i32
    %c0_i32_1 = arith.constant 0 : i32
    return %c0_i32, %c0_i32_0 : i32, i32
  }
  func.func @transform_5(%arg0: i32) -> (i32, i32) {
    %c0_i32 = arith.constant 0 : i32
    %c0_i32_0 = arith.constant 0 : i32
    %c0_i32_1 = arith.constant 0 : i32
    return %c0_i32, %c0_i32_0 : i32, i32
  }
  func.func @transform_6(%arg0: i32) -> (i32, i32) {
    %c0_i32 = arith.constant 0 : i32
    %c0_i32_0 = arith.constant 0 : i32
    return %arg0, %c0_i32 : i32, i32
  }
}

</mosaic_0001>

<bundles_post_ra>
// kernel: tpu_custom_call.1
= control target key start
LH: loop header
LB: loop body
LE: loop exit
PB: predicated region body
PF: predicated region fallthrough
CT: control target
= control target key end

     0   :  { %11 = vsyncpa [#allocation3], 0  ;;  %s938_s0 = inlined_call_operand.hbm [shape: f32[8,16], index: 0, kind: input, shape index: {}]   ;;  %s939_s1 = inlined_call_operand.hbm [shape: bf16[16,128], index: 1, kind: input, shape index: {}]   ;;  %s940_s2 = inlined_call_operand.hbm [shape: bf16[2,128,128], index: 2, kind: input, shape index: {}]   ;;  %s941_s3 = inlined_call_operand.hbm [shape: bf16[128,128], index: 3, kind: input, shape index: {}]   ;;  %s942_s4 = inlined_call_operand.vmem [shape: f32[3,128], index: 4, kind: input, shape index: {}]   ;;  %s943_s5 = inlined_call_operand.vmem [shape: f32[1,128], index: 5, kind: input, shape index: {}]   ;;  %s944_s6 = inlined_call_operand.hbm [shape: bf16[8,128], index: 6, kind: output, shape index: {}]  }
   0x1   :  { %12 = vsyncpa [#allocation6], 0 }
   0x2   :  { %13 = vsyncpa [#allocation9], 0 }
   0x3   :  { %14 = vsyncpa [#allocation4], 0  ;;  %s784_s21 = smov [#allocation5]   ;;  %s666_s25 = scalar_lea.hbm %s939_s1, 128 }
   0x4   :  { %s30_s22 = sshll.u32 %s784_s21, 4  ;;  %p667_p0 = scmp.ne.s32.totalorder %s939_s1, %s666_s25  ;;  %s31_s22 = int_to_ptr.vmem [resolvable:$true] %s30_s22 }
   0x5   :  { %p670_p1 = scmp.lt.u32.totalorder %s666_s25, %s939_s1 }
   0x7   :  { %p672_p2 = pnand %p670_p1, %p667_p0 }
   0x9   :  { %675 = shalt.err (!%p672_p2)
}
   0xa   :  { %s676_s30 = scalar_lea.vmem %s31_s22, 128  ;;  %p681_p4 = scmp.lt.s32.totalorder %s31_s22, %s31_s22 }
   0xb   :  { %p677_p3 = scmp.ne.s32.totalorder %s31_s22, %s676_s30  ;;  %p682_p5 = scmp.lt.s32.totalorder %s676_s30, %s676_s30 }
   0xd   :  { %p683_p6 = por %p682_p5, %p681_p4 }
   0xf   :  { %p684_p7 = pnand %p683_p6, %p677_p3 }
  0x11   :  { %687 = shalt.err (!%p684_p7)
}
  0x12   :  { %s785_s7 = smov 64   ;;  %s786_s8 = smov 4  }
  0x13   :  { %36 = dma.hbm_to_vmem [thread:$0]  %s939_s1, 128, %s31_s22, [#allocation6], %s785_s7, %s785_s7, %s786_s8  }
  0x14   :  { %s787_s11 = smov [#allocation2]   ;;  %s788_s13 = smov [#allocation7]  }
  0x15   :  { %s21_s12 = sshll.u32 %s787_s11, 4  ;;  %s42_s14 = sshll.u32 %s788_s13, 4  ;;  %s22_s12 = int_to_ptr.vmem [resolvable:$true] %s21_s12  ;;  %s43_s14 = int_to_ptr.vmem [resolvable:$true] %s42_s14 }
  0x16   :  { %s688_s17 = scalar_lea.hbm %s938_s0, 128 }
  0x17   :  { %p689_p8 = scmp.ne.s32.totalorder %s938_s0, %s688_s17  ;;  %p692_p9 = scmp.lt.u32.totalorder %s688_s17, %s938_s0 }
  0x19   :  { %p694_p10 = pnand %p692_p9, %p689_p8 }
  0x1b   :  { %697 = shalt.err (!%p694_p10)
}
  0x1c   :  { %s698_s1 = scalar_lea.vmem %s22_s12, 128  ;;  %p703_p12 = scmp.lt.s32.totalorder %s22_s12, %s22_s12 }
  0x1d   :  { %p699_p11 = scmp.ne.s32.totalorder %s22_s12, %s698_s1  ;;  %p704_p13 = scmp.lt.s32.totalorder %s698_s1, %s698_s1 }
  0x1f   :  { %p705_p0 = por %p704_p13, %p703_p12 }
  0x21   :  { %p706_p1 = pnand %p705_p0, %p699_p11 }
  0x23   :  { %709 = shalt.err (!%p706_p1)
}
  0x24   :  { %24 = dma.hbm_to_vmem [thread:$0]  %s938_s0, 128, %s22_s12, [#allocation3]  }
  0x25   :  { %s710_s26 = scalar_lea.hbm %s940_s2, 2048 }
  0x26   :  { %p711_p2 = scmp.ne.s32.totalorder %s940_s2, %s710_s26  ;;  %p714_p3 = scmp.lt.u32.totalorder %s710_s26, %s940_s2 }
  0x28   :  { %p716_p4 = pnand %p714_p3, %p711_p2 }
  0x2a   :  { %719 = shalt.err (!%p716_p4)
}
  0x2b   :  { %s720_s9 = scalar_lea.vmem %s43_s14, 2048  ;;  %p725_p6 = scmp.lt.s32.totalorder %s43_s14, %s43_s14 }
  0x2c   :  { %p721_p5 = scmp.ne.s32.totalorder %s43_s14, %s720_s9  ;;  %p726_p7 = scmp.lt.s32.totalorder %s720_s9, %s720_s9 }
  0x2e   :  { %p727_p8 = por %p726_p7, %p725_p6 }
  0x30   :  { %p728_p9 = pnand %p727_p8, %p721_p5 }
  0x32   :  { %731 = shalt.err (!%p728_p9)
}
  0x33   :  { %48 = dma.hbm_to_vmem [thread:$0]  %s940_s2, 2048, %s43_s14, [#allocation6], %s785_s7, %s785_s7, %s786_s8  }
  0x34   :  { %s789_s11 = smov [#allocation8]   ;;  %s732_s16 = scalar_lea.hbm %s941_s3, 1024 }
  0x35   :  { %s54_s12 = sshll.u32 %s789_s11, 4  ;;  %p733_p10 = scmp.ne.s32.totalorder %s941_s3, %s732_s16  ;;  %s55_s12 = int_to_ptr.vmem [resolvable:$true] %s54_s12 }
  0x36   :  { %p736_p11 = scmp.lt.u32.totalorder %s732_s16, %s941_s3 }
  0x38   :  { %p738_p12 = pnand %p736_p11, %p733_p10 }
  0x3a   :  { %741 = shalt.err (!%p738_p12)
}
  0x3b   :  { %s742_s21 = scalar_lea.vmem %s55_s12, 1024  ;;  %p747_p0 = scmp.lt.s32.totalorder %s55_s12, %s55_s12 }
  0x3c   :  { %p743_p13 = scmp.ne.s32.totalorder %s55_s12, %s742_s21  ;;  %p748_p1 = scmp.lt.s32.totalorder %s742_s21, %s742_s21 }
  0x3e   :  { %p749_p2 = por %p748_p1, %p747_p0 }
  0x40   :  { %p750_p3 = pnand %p749_p2, %p743_p13 }
  0x42   :  { %753 = shalt.err (!%p750_p3)
}
  0x43   :  { %60 = dma.hbm_to_vmem [thread:$0]  %s941_s3, 1024, %s55_s12, [#allocation9], %s785_s7, %s785_s7, %s786_s8  }
  0x44   :  { %776 = dma.done.wait [#allocation3], 128  }
  0x45   :  { %777 = vsyncadd [#allocation3], 4294967168 }
  0x46   :  { %778 = dma.done.wait [#allocation6], 2176  }
  0x47   :  { %779 = vsyncadd [#allocation6], 4294965120 }
  0x48   :  { %780 = dma.done.wait [#allocation9], 1024  }
  0x49   :  { %781 = vsyncadd [#allocation9], 4294966272  ;;  %v790_v0 = vmov 0.0   ;;  %vm791_vm0 = vmmov 0   ;;  %v637_v1 = vld [vmem:[#allocation5] sm:$0xff]   ;;  %v78_v2 = vld [vmem:[#allocation2] sm:$0xff]  ;;  %v83_v18 = vlaneseq }
  0x4a   :  { %562 = vmatprep.subr.bf16.mxu0 %v790_v0  ;;  %564 = vmatprep.mubr.msk.bf16.mxu0 %vm791_vm0, %v790_v0  ;;  %v79_v3 = vpack.c.bf16 %v78_v2, %v78_v2  ;;  %vm93_vm1 = vcmask 130048   ;;  %v638_v4 = vld [vmem:[#allocation7] sm:$0xff]   ;;  %v639_v5 = vld [vmem:[#allocation7 + $0x8] sm:$0xff]   ;;  %v640_v6 = vld [vmem:[#allocation7 + $0x10] sm:$0xff]  }
  0x4b   :  { %568 = vmatprep.subr.bf16.mxu1 %v790_v0  ;;  %584 = vmatprep.mubr.msk.bf16.mxu1 %vm791_vm0, %v790_v0  ;;  %v641_v7 = vld [vmem:[#allocation7 + $0x18] sm:$0xff]   ;;  %v642_v8 = vld [vmem:[#allocation7 + $0x20] sm:$0xff]   ;;  %v643_v9 = vld [vmem:[#allocation7 + $0x28] sm:$0xff]   ;;  %v84_v19 = vshrl.u32 %v83_v18, 7  ;;  %v472_v58 = vand.u32 127, %v83_v18 }
  0x4c   :  { %563 = vmatpush3.bf16.msra.mxu0 %v637_v1  ;;  %569 = vmatpush3.bf16.msra.mxu1 %v638_v4  ;;  %v644_v10 = vld [vmem:[#allocation7 + $0x30] sm:$0xff]   ;;  %v645_v11 = vld [vmem:[#allocation7 + $0x38] sm:$0xff]   ;;  %v646_v12 = vld [vmem:[#allocation7 + $0x40] sm:$0xff]  }
  0x4d   :  { %588 = vmatprep.subr.bf16.mxu0 %v790_v0  ;;  %570 = vmatprep.subr.bf16.mxu1 %v790_v0  ;;  %v647_v13 = vld [vmem:[#allocation7 + $0x48] sm:$0xff]   ;;  %v648_v14 = vld [vmem:[#allocation7 + $0x50] sm:$0xff]   ;;  %v649_v15 = vld [vmem:[#allocation7 + $0x58] sm:$0xff]   ;;  %v85_v20 = vsub.s32 0, %v84_v19  ;;  %v157_v38 = vsub.s32 1, %v84_v19  ;;  %v268_v49 = vsub.s32 2, %v84_v19 }
  0x4e   :  { %v650_v16 = vld [vmem:[#allocation7 + $0x60] sm:$0xff]   ;;  %v651_v17 = vld [vmem:[#allocation7 + $0x68] sm:$0xff]   ;;  %v80_v21 = vld [vmem:[%s942_s4] sm:$0x7]  ;;  %vm484_vm2 = vcmp.eq.s32.totalorder %v472_v58, 4  ;;  %vm473_vm3 = vcmp.lt.s32.totalorder %v472_v58, 4 }
  0x4f   :  { %565 = vmatmul.mubr.msk.bf16.vlgmr.msra.gmra.mrb[0].mxu0 %vm93_vm1, %v79_v3  ;;  %v86_v22 = vrot.slane %v80_v21, %v85_v20  ;;  %v652_v30 = vld [vmem:[#allocation7 + $0x70] sm:$0xff]   ;;  %v653_v31 = vld [vmem:[#allocation7 + $0x78] sm:$0xff]   ;;  %v654_v32 = vld [vmem:[#allocation8] sm:$0xff]   ;;  %v158_v39 = vrot.slane %v80_v21, %v157_v38  ;;  %v269_v50 = vrot.slane %v80_v21, %v268_v49 }
  0x50   :  { %604 = vmatprep.mubr.msk.bf16.mxu0 %vm791_vm0, %v790_v0  ;;  %571 = vmatpush3.bf16.msra.mxu1 %v639_v5  ;;  %v655_v33 = vld [vmem:[#allocation8 + $0x8] sm:$0xff]   ;;  %v656_v34 = vld [vmem:[#allocation8 + $0x10] sm:$0xff]   ;;  %v657_v35 = vld [vmem:[#allocation8 + $0x18] sm:$0xff]  }
  0x51   :  { %572 = vmatprep.subr.bf16.mxu1 %v790_v0  ;;  %589 = vmatpush3.bf16.msra.mxu0 %v646_v12  ;;  %v658_v36 = vld [vmem:[#allocation8 + $0x20] sm:$0xff]   ;;  %v659_v37 = vld [vmem:[#allocation8 + $0x28] sm:$0xff]   ;;  %v660_v47 = vld [vmem:[#allocation8 + $0x30] sm:$0xff]  }
  0x52   :  { %590 = vmatprep.subr.bf16.mxu0 %v790_v0  ;;  %v661_v48 = vld [vmem:[#allocation8 + $0x38] sm:$0xff]   ;;  %v524_v59 = vld [vmem:[%s943_s5] ss:$0 sm:$0xff]  ;;  %s792_s5 = smov [#allocation10]  }
  0x53   :  { %s495_s1 = sshll.u32 %s792_s5, 4  ;;  %s496_s1 = int_to_ptr.vmem [resolvable:$true] %s495_s1 }
  0x54   :  { %573 = vmatpush3.bf16.msra.mxu1 %v640_v6  ;;  %s754_s22 = scalar_lea.vmem %s496_s1, 64  ;;  %p759_p5 = scmp.lt.s32.totalorder %s496_s1, %s496_s1 }
  0x55   :  { %574 = vmatprep.subr.bf16.mxu1 %v790_v0  ;;  %591 = vmatpush3.bf16.msra.mxu0 %v647_v13  ;;  %p755_p4 = scmp.ne.s32.totalorder %s496_s1, %s754_s22  ;;  %p760_p6 = scmp.lt.s32.totalorder %s754_s22, %s754_s22 }
  0x56   :  { %592 = vmatprep.subr.bf16.mxu0 %v790_v0 }
  0x57   :  { %p761_p7 = por %p760_p6, %p759_p5 }
  0x58   :  { %575 = vmatpush3.bf16.msra.mxu1 %v641_v7 }
  0x59   :  { %576 = vmatprep.subr.bf16.mxu1 %v790_v0  ;;  %593 = vmatpush3.bf16.msra.mxu0 %v648_v14  ;;  %p762_p8 = pnand %p761_p7, %p755_p4 }
  0x5a   :  { %594 = vmatprep.subr.bf16.mxu0 %v790_v0 }
  0x5c   :  { %577 = vmatpush3.bf16.msra.mxu1 %v642_v8 }
  0x5d   :  { %578 = vmatprep.subr.bf16.mxu1 %v790_v0  ;;  %595 = vmatpush3.bf16.msra.mxu0 %v649_v15 }
  0x5e   :  { %596 = vmatprep.subr.bf16.mxu0 %v790_v0 }
  0x60   :  { %579 = vmatpush3.bf16.msra.mxu1 %v643_v9 }
  0x61   :  { %580 = vmatprep.subr.bf16.mxu1 %v790_v0  ;;  %597 = vmatpush3.bf16.msra.mxu0 %v650_v16 }
  0x62   :  { %598 = vmatprep.subr.bf16.mxu0 %v790_v0 }
  0x64   :  { %581 = vmatpush3.bf16.msra.mxu1 %v644_v10 }
  0x65   :  { %582 = vmatprep.subr.bf16.mxu1 %v790_v0  ;;  %599 = vmatpush3.bf16.msra.mxu0 %v651_v17 }
  0x66   :  { %600 = vmatprep.subr.bf16.mxu0 %v790_v0 }
  0x68   :  { %583 = vmatpush3.bf16.msra.mxu1 %v645_v11 }
  0x69   :  { %608 = vmatprep.subr.bf16.mxu1 %v790_v0  ;;  %601 = vmatpush3.bf16.msra.mxu0 %v652_v30 }
  0x6a   :  { %602 = vmatprep.subr.bf16.mxu0 %v790_v0 }
  0x6d   :  { %603 = vmatpush3.bf16.msra.mxu0 %v653_v31 }
 0x122   :  { %v131_v23 = vpop.f32.mrb[0].mxu0 }
 0x123   :  { %v132_v24 = vadd.f32 %v131_v23, %v86_v22  ;;  %v566_v25 = vpop.f32.mrb[1].mxu0 }
 0x124   :  { %v134_v26 = vpop.f32.mrb[2].mxu0 }
 0x125   :  { %v137_v27 = vmax.f32 %v132_v24, 0.0  ;;  %v567_v28 = vpop.f32.mrb[3].mxu0 }
 0x127   :  { %v138_v29 = vpack.c.bf16 %v137_v27, %v137_v27 }
 0x129   :  { %585 = vmatmul.mubr.bf16.vlgmr.msra.gmra.mrb[0].mxu1 %v138_v29 }
 0x12a   :  { %624 = vmatprep.mubr.msk.bf16.mxu1 %vm791_vm0, %v790_v0  ;;  %609 = vmatpush3.bf16.msra.mxu1 %v654_v32 }
 0x12b   :  { %610 = vmatprep.subr.bf16.mxu1 %v790_v0 }
 0x12e   :  { %611 = vmatpush3.bf16.msra.mxu1 %v655_v33 }
 0x12f   :  { %612 = vmatprep.subr.bf16.mxu1 %v790_v0 }
 0x132   :  { %613 = vmatpush3.bf16.msra.mxu1 %v656_v34 }
 0x133   :  { %614 = vmatprep.subr.bf16.mxu1 %v790_v0 }
 0x136   :  { %615 = vmatpush3.bf16.msra.mxu1 %v657_v35 }
 0x137   :  { %616 = vmatprep.subr.bf16.mxu1 %v790_v0 }
 0x13a   :  { %617 = vmatpush3.bf16.msra.mxu1 %v658_v36 }
 0x13b   :  { %618 = vmatprep.subr.bf16.mxu1 %v790_v0 }
 0x13e   :  { %619 = vmatpush3.bf16.msra.mxu1 %v659_v37 }
 0x13f   :  { %620 = vmatprep.subr.bf16.mxu1 %v790_v0 }
 0x142   :  { %621 = vmatpush3.bf16.msra.mxu1 %v660_v47 }
 0x143   :  { %622 = vmatprep.subr.bf16.mxu1 %v790_v0 }
 0x146   :  { %623 = vmatpush3.bf16.msra.mxu1 %v661_v48 }
 0x1fc   :  { %v241_v40 = vpop.f32.mrb[0].mxu1 }
 0x1fd   :  { %v242_v41 = vadd.f32 %v241_v40, %v158_v39  ;;  %v586_v42 = vpop.f32.mrb[1].mxu1 }
 0x1fe   :  { %v244_v43 = vpop.f32.mrb[2].mxu1 }
 0x1ff   :  { %v247_v44 = vmax.f32 %v242_v41, 0.0  ;;  %v587_v45 = vpop.f32.mrb[3].mxu1 }
 0x201   :  { %v248_v46 = vpack.c.bf16 %v247_v44, %v247_v44 }
 0x203   :  { %605 = vmatmul.mubr.bf16.vlgmr.msra.gmra.mrb[4].mxu0 %v248_v46 }
 0x2d6   :  { %v352_v51 = vpop.f32.mrb[4].mxu0 }
 0x2d7   :  { %v353_v52 = vadd.f32 %v352_v51, %v269_v50  ;;  %v606_v53 = vpop.f32.mrb[5].mxu0 }
 0x2d8   :  { %v355_v54 = vpop.f32.mrb[6].mxu0 }
 0x2d9   :  { %v358_v55 = vmax.f32 %v353_v52, 0.0  ;;  %v607_v56 = vpop.f32.mrb[7].mxu0 }
 0x2db   :  { %v359_v57 = vpack.c.bf16 %v358_v55, %v358_v55 }
 0x2dd   :  { %625 = vmatmul.mubr.bf16.vlgmr.msra.gmra.mrb[4].mxu1 %v359_v57 }
 0x3b0   :  { %v465_v60 = vpop.f32.mrb[4].mxu1 }
 0x3b1   :  { %v466_v61 = vadd.f32 %v524_v59, %v465_v60  ;;  %v626_v62 = vpop.f32.mrb[5].mxu1 }
 0x3b2   :  { %v468_v63 = vpop.f32.mrb[6].mxu1 }
 0x3b3   :  { %v485_v0 = vsel %vm484_vm2, %v466_v61, 0.0  ;;  %v627_v1 = vpop.f32.mrb[7].mxu1  ;;  %v474_v2 = vsel %vm473_vm3, %v466_v61, -1e+30 }
 0x3b4   :  { %475 = vmax.xlane.f32.xlu0 %v474_v2 }
 0x441   :  { %v476_v3 = vpop.xlane.xlu0 %475 }
 0x442   :  { %v477_v4 = vsub.f32 %v474_v2, %v476_v3 }
 0x444   :  { %v478_v5 = vmul.f32 1.442695, %v477_v4 }
 0x446   :  { %662 = vpow2.f32 %v478_v5 }
 0x450   :  { %v663_v6 = vpop.eup %662 }
 0x451   :  { %480 = vadd.xlane.f32.xlu0 %v663_v6 }
 0x4de   :  { %v481_v7 = vpop.xlane.xlu0 %480 }
 0x4df   :  { %664 = vrcp.f32 %v481_v7 }
 0x4e9   :  { %v665_v8 = vpop.eup %664 }
 0x4ea   :  { %v483_v9 = vmul.f32 %v665_v8, %v663_v6 }
 0x4ec   :  { %v486_v10 = vsel %vm473_vm3, %v483_v9, %v485_v0 }
 0x4ed   :  { %v487_v11 = vpack.c.bf16 %v486_v10, %v486_v10 }
 0x4ef   :  { %488 = vst [vmem:[#allocation10] sm:$0xf] %v487_v11 }
 0x4f0   :  { %765 = shalt.err (!%p762_p8)
}
 0x4f1   :  { %s766_s25 = scalar_lea.hbm %s944_s6, 64 }
 0x4f2   :  { %p767_p9 = scmp.ne.s32.totalorder %s944_s6, %s766_s25  ;;  %p770_p10 = scmp.lt.u32.totalorder %s766_s25, %s944_s6 }
 0x4f4   :  { %p772_p11 = pnand %p770_p10, %p767_p9 }
 0x4f6   :  { %775 = shalt.err (!%p772_p11)
}
 0x4f7   :  { %498 = dma.vmem_to_hbm [thread:$0]  %s496_s1, 64, %s944_s6, [#allocation4]  }
 0x4f8   :  { %782 = dma.done.wait [#allocation4], 64  }
 0x4f9   :  { %783 = vsyncadd [#allocation4], 4294967232 }
 0x4fa   :  { %502 = vsyncpa [#allocation3], 1 }
 0x4fb   :  { %503 = vsyncpa [#allocation6], 1 }
 0x4fc   :  { %504 = vsyncpa [#allocation9], 1 }
 0x4fd   :  { %505 = vsyncpa [#allocation4], 1 }

</bundles_post_ra>
